<compile_context>
chip_gen: v7x
topology: tpu7x:2x2x1
jax: 0.10.0
libtpu: 0.0.40
codegen_flags: <defaults>
</compile_context>

<pallas_src>
import numpy as np
import jax
import jax.numpy as jnp
from jax import lax
from jax.experimental import pallas as pl
from jax.experimental.pallas import tpu as pltpu


# ---------------------------------------------------------------------------
# Kernel: one (batch b, output tile m) step of the expand/gather.
# ---------------------------------------------------------------------------
def _length_regulator_kernel(lower_ref, upper_ref, x_ref, o_ref):
    # lower_ref / upper_ref : (1, 1, T) int32   segment bounds for batch b
    # x_ref                 : (1, T, C)         input frames for batch b
    # o_ref                 : (1, TM, C)        output tile (TM rows of expanded seq)
    TM = o_ref.shape[1]
    T = x_ref.shape[1]

    m0 = pl.program_id(1) * TM
    # Row index of each output position in this tile, broadcast over T.
    m_ids = m0 + lax.broadcasted_iota(jnp.int32, (TM, T), 0)      # (TM, T)

    lower = lower_ref[0]                                          # (1, T)
    upper = upper_ref[0]                                          # (1, T)

    # one-hot selection matrix: exactly one 1 per output row
    onehot = jnp.logical_and(m_ids >= lower, m_ids < upper).astype(x_ref.dtype)

    # Gather as an MXU matmul: (TM, T) @ (T, C) -> (TM, C).  Exact, since each
    # row of `onehot` selects a single input frame.
    o_ref[0] = jnp.dot(onehot, x_ref[0],
                       preferred_element_type=jnp.float32).astype(o_ref.dtype)


# ---------------------------------------------------------------------------
# Wrapper: LengthRegulator.forward(x, dur)
# ---------------------------------------------------------------------------
def length_regulator(x, dur, *, tile_m=128):
    """x: (B, T, C) float, dur: (B, T) float/int durations -> (B, max_dur, C)."""
    B, T, C = x.shape

    dur = jnp.maximum(jnp.asarray(dur), 0)                    # dur[dur < 0] = 0
    tot = jnp.cumsum(dur, axis=1).astype(jnp.int32)           # (B, T), truncating cast

    # TODO(synk): output length is data-dependent; computed eagerly on host
    # (mirrors torch's .detach().cpu().numpy() in build_index).  Inside jit one
    # would have to pass a static max_len instead.
    max_duration = int(jax.device_get(jnp.max(tot)))
    if max_duration == 0:
        return jnp.zeros((B, 0, C), x.dtype)

    # Segment [lower[t], upper[t]) of output rows that copy input frame t.
    lower = jnp.concatenate([jnp.zeros((B, 1), jnp.int32), tot[:, :-1]], axis=1)
    BIG = jnp.int32(1 << 30)
    upper = tot.at[:, -1].set(BIG)      # tail positions clamp to the last frame

    m_pad = pl.cdiv(max_duration, tile_m) * tile_m
    grid = (B, m_pad // tile_m)

    out = pl.pallas_call(
        _length_regulator_kernel,
        out_shape=jax.ShapeDtypeStruct((B, m_pad, C), x.dtype),
        grid_spec=pltpu.PrefetchScalarGridSpec(
            num_scalar_prefetch=0,
            grid=grid,
            in_specs=[
                pl.BlockSpec((1, 1, T), lambda b, m: (b, 0, 0)),   # lower
                pl.BlockSpec((1, 1, T), lambda b, m: (b, 0, 0)),   # upper
                pl.BlockSpec((1, T, C), lambda b, m: (b, 0, 0)),   # x[b]
            ],
            out_specs=pl.BlockSpec((1, tile_m, C), lambda b, m: (b, m, 0)),
        ),
        compiler_params=pltpu.CompilerParams(
            dimension_semantics=("parallel", "parallel")),
    )(lower.reshape(B, 1, T), upper.reshape(B, 1, T), x)

    return out[:, :max_duration, :]


# ---------------------------------------------------------------------------
# Reference: direct transcription of the PyTorch build_index / gather.
# ---------------------------------------------------------------------------
def ref_length_regulator(x, dur):
    x_np = np.asarray(x)
    dur_np = np.array(dur, copy=True)
    dur_np[dur_np < 0] = 0
    tot = dur_np.cumsum(1).astype('int64')
    max_duration = int(tot.max())
    B, T, C = x_np.shape
    index = np.zeros([B, max_duration, C], dtype='int64')
    for i in range(B):
        pos = 0
        for j in range(T):
            pos1 = tot[i, j]
            index[i, pos:pos1, :] = j
            pos = pos1
        index[i, pos:, :] = j
    return np.take_along_axis(x_np, index, axis=1)


if __name__ == "__main__":
    B, T, C = 2, 16, 64

    k0, k1 = jax.random.split(jax.random.PRNGKey(0))
    x = jax.random.normal(k0, (B, T, C), jnp.float32)
    # integer-valued float durations in [-1, 4]; includes negatives (clamped) and zeros
    dur = jax.random.randint(k1, (B, T), -1, 5).astype(jnp.float32)

    y = length_regulator(x, dur)
    y = jax.block_until_ready(y)

    y_ref = ref_length_regulator(x, dur)
    assert y.shape == y_ref.shape, (y.shape, y_ref.shape)
    max_err = float(np.max(np.abs(np.asarray(y) - y_ref))) if y_ref.size else 0.0
    assert np.allclose(np.asarray(y), y_ref, atol=1e-5, rtol=1e-5), max_err
    print("KERNEL_OK")
</pallas_src>

<mosaic_0001>
module attributes {stable_mosaic.version = 11 : i64} {
  func.func @_length_regulator_kernel(%arg0: i32, %arg1: i32, %arg2: memref<1x1x16xi32, #tpu.memory_space<vmem>>, %arg3: memref<1x1x16xi32, #tpu.memory_space<vmem>>, %arg4: memref<1x16x64xf32, #tpu.memory_space<vmem>>, %arg5: memref<1x128x64xf32, #tpu.memory_space<vmem>>) attributes {dimension_semantics = [#tpu.dimension_semantics<parallel>, #tpu.dimension_semantics<parallel>], iteration_bounds = array<i64: 2, 1>, scalar_prefetch = 0 : i64, scratch_operands = 0 : i64, tpu.core_type = #tpu.core_type<tc>, window_params = [{transform_indices = @transform_0, window_bounds = array<i64: 1, 1, 16>}, {transform_indices = @transform_1, window_bounds = array<i64: 1, 1, 16>}, {transform_indices = @transform_2, window_bounds = array<i64: 1, 16, 64>}, {transform_indices = @transform_3, window_bounds = array<i64: 1, 128, 64>}]} {
    %c128_i32 = arith.constant 128 : i32
    %0 = arith.muli %arg1, %c128_i32 : i32
    %1 = tpu.iota {dimensions = array<i32: 0>} : vector<128x16xi32>
    %2 = vector.broadcast %0 : i32 to vector<128x16xi32>
    %3 = arith.addi %2, %1 : vector<128x16xi32>
    %c0 = arith.constant 0 : index
    %c0_0 = arith.constant 0 : index
    %c0_1 = arith.constant 0 : index
    %4 = vector.load %arg2[%c0, %c0_0, %c0_1] : memref<1x1x16xi32, #tpu.memory_space<vmem>>, vector<1x1x16xi32>
    %5 = vector.shape_cast %4 : vector<1x1x16xi32> to vector<1x16xi32>
    %c0_2 = arith.constant 0 : index
    %c0_3 = arith.constant 0 : index
    %c0_4 = arith.constant 0 : index
    %6 = vector.load %arg3[%c0_2, %c0_3, %c0_4] : memref<1x1x16xi32, #tpu.memory_space<vmem>>, vector<1x1x16xi32>
    %7 = vector.shape_cast %6 : vector<1x1x16xi32> to vector<1x16xi32>
    %8 = vector.broadcast %5 : vector<1x16xi32> to vector<128x16xi32>
    %9 = arith.cmpi sge, %3, %8 : vector<128x16xi32>
    %10 = vector.broadcast %7 : vector<1x16xi32> to vector<128x16xi32>
    %11 = arith.cmpi slt, %3, %10 : vector<128x16xi32>
    %12 = arith.andi %9, %11 : vector<128x16xi1>
    %13 = arith.extui %12 : vector<128x16xi1> to vector<128x16xi32>
    %14 = arith.sitofp %13 : vector<128x16xi32> to vector<128x16xf32>
    %c0_5 = arith.constant 0 : index
    %c0_6 = arith.constant 0 : index
    %c0_7 = arith.constant 0 : index
    %15 = vector.load %arg4[%c0_5, %c0_6, %c0_7] : memref<1x16x64xf32, #tpu.memory_space<vmem>>, vector<1x16x64xf32>
    %16 = vector.shape_cast %15 : vector<1x16x64xf32> to vector<16x64xf32>
    %cst = arith.constant dense<0.000000e+00> : vector<128x64xf32>
    %17 = tpu.matmul %14, %16, %cst {dimension_numbers = #tpu.dot_dimension_numbers<[1], [0], [0], [1], [0, 0, 1, 1], [], []>} : vector<128x16xf32>, vector<16x64xf32>, vector<128x64xf32> -> vector<128x64xf32>
    %c0_8 = arith.constant 0 : index
    %c0_9 = arith.constant 0 : index
    %c0_10 = arith.constant 0 : index
    %18 = vector.load %arg5[%c0_8, %c0_9, %c0_10] : memref<1x128x64xf32, #tpu.memory_space<vmem>>, vector<1x128x64xf32>
    %19 = vector.shape_cast %18 : vector<1x128x64xf32> to vector<128x64xf32>
    %20 = vector.shape_cast %17 : vector<128x64xf32> to vector<1x128x64xf32>
    tpu.vector_store %arg5[%c0_8, %c0_9, %c0_10], %20 {strides = array<i32>} : memref<1x128x64xf32, #tpu.memory_space<vmem>>, vector<1x128x64xf32>,
    return
  }
  func.func @transform_0(%arg0: i32, %arg1: i32) -> (i32, i32, i32) {
    %c0_i32 = arith.constant 0 : i32
    %c0_i32_0 = arith.constant 0 : i32
    %c0_i32_1 = arith.constant 0 : i32
    return %arg0, %c0_i32, %c0_i32_0 : i32, i32, i32
  }
  func.func @transform_1(%arg0: i32, %arg1: i32) -> (i32, i32, i32) {
    %c0_i32 = arith.constant 0 : i32
    %c0_i32_0 = arith.constant 0 : i32
    %c0_i32_1 = arith.constant 0 : i32
    return %arg0, %c0_i32, %c0_i32_0 : i32, i32, i32
  }
  func.func @transform_2(%arg0: i32, %arg1: i32) -> (i32, i32, i32) {
    %c0_i32 = arith.constant 0 : i32
    %c0_i32_0 = arith.constant 0 : i32
    %c0_i32_1 = arith.constant 0 : i32
    return %arg0, %c0_i32, %c0_i32_0 : i32, i32, i32
  }
  func.func @transform_3(%arg0: i32, %arg1: i32) -> (i32, i32, i32) {
    %c0_i32 = arith.constant 0 : i32
    %c0_i32_0 = arith.constant 0 : i32
    return %arg0, %arg1, %c0_i32 : i32, i32, i32
  }
}

</mosaic_0001>

<bundles_post_ra>
// kernel: tpu_custom_call.1
= control target key start
LH: loop header
LB: loop body
LE: loop exit
PB: predicated region body
PF: predicated region fallthrough
CT: control target
= control target key end

     0   :  { %8 = vsyncpa [#allocation3], 0  ;;  %s1369_s0 = inlined_call_operand.hbm [shape: s32[2,1,16], index: 0, kind: input, shape index: {}]   ;;  %s1370_s1 = inlined_call_operand.vmem [shape: s32[2,1,16], index: 1, kind: input, shape index: {}]   ;;  %s1371_s2 = inlined_call_operand.hbm [shape: f32[2,16,64], index: 2, kind: input, shape index: {}]   ;;  %s1372_s3 = inlined_call_operand.vmem [shape: f32[2,128,64], index: 3, kind: output, shape index: {}]  }
   0x1   :  { %10 = vsyncpa [#allocation3 + $0x1], 0 }
   0x2   :  { %11 = vsyncpa [#allocation5], 0 }
   0x3   :  { %13 = vsyncpa [#allocation5 + $0x1], 0  ;;  %s1027_s12 = smov 0   ;;  %s1029_s13 = smov 0  }
   0x4   :  { %s1031_s14 = smov 0   ;;  %s1033_s15 = smov 0  }
   0x5   :  { %s1035_s16 = smov 0   ;;  %s1037_s17 = smov 0  }
   0x6 LB: > { %s721_s18 = sadd.s32 4294967295, %s1000_s17   ;;  %s31_s19 = sadd.s32 1, %s996_s16  ;;  %s1000_s17 = sphi %s1037_s17, %s19_s17   ;;  %s996_s16 = sphi %s1035_s16, %s1385_s16   ;;  %s992_s15 = sphi %s1033_s15, %s1384_s15   ;;  %s988_s14 = sphi %s1031_s14, %s1383_s14   ;;  %s984_s13 = sphi %s1029_s13, %s1382_s13   ;;  %s980_s12 = sphi %s1027_s12, %s1381_s12  }
   0x7   : > { %p33_p0 = scmp.ge.s32.totalorder %s31_s19, 2  ;;  %s38_s20 = sadd.s32 1, %s988_s14 }
   0x8   : > { %p45_p1 = scmp.ne.s32.totalorder %s988_s14, %s984_s13  ;;  %p46_p2 = scmp.eq.s32.totalorder %s1000_s17, 0 }
   0x9   : > { %s1387_s19 = smov (%p33_p0, %s31_s19), 0  ;;  %p51_p4 = scmp.ne.s32.totalorder %s984_s13, %s980_s12 }
   0xa   : > { %p1063_p3 = por %p46_p2, %p45_p1  ;;  %s35_s22 = ssub.s32 %s996_s16, %s1387_s19 }
   0xb   : > { %p52_p5 = scmp.eq.s32.totalorder %s721_s18, 0  ;;  %p36_p6 = scmp.eq.s32.totalorder %s35_s22, 0 }
   0xc   : > { %p834_p8 = scmp.lt.s32.totalorder %s1000_s17, 2  ;;  %s1079_s25 = sand.u32 1, %s988_s14  }
   0xd   : > { %p1070_p7 = por %p52_p5, %p51_p4  ;;  %s725_s26 = sshll.u32 %s996_s16, 4 }
   0xe   : > { %s1076_s24 = scalar_select %p36_p6, %s988_s14, %s38_s20  }
   0xf   : > { %s1375_s23 = scalar_select %p1070_p7, 1, 0 }
  0x10   : > { %s1085_s29 = scalar_lea.hbm %s1369_s0, %s725_s26  ;;  %s158_s30 = scalar_lea.vmem [#allocation2], %s1079_s25 }
  0x11   : > { %s165_s4 = sshll.u32 %s158_s30, 4  ;;  %p1092_p9 = pnand %p834_p8, %p1063_p3  ;;  %s1088_s4 = int_to_ptr.vmem [resolvable:$true] %s165_s4 }
  0x12   : > { %s156_s6 = scalar_lea.sflag [#allocation3], %s1079_s25  ;;  %s886_s7 = scalar_lea.hbm %s1085_s29, 16 }
  0x13   : > { %p887_p12 = scmp.ne.s32.totalorder %s1085_s29, %s886_s7  ;;  %p888_p13 = pneg %p1092_p9 }
  0x14   : > { %s891_s10 = scalar_lea.hbm %s1369_s0, 32  ;;  %p892_p2 = scmp.lt.u32.totalorder %s1085_s29, %s1369_s0 }
  0x15   : > { %p889_p0 = pnand %p888_p13, %p887_p12  ;;  %p893_p3 = scmp.lt.u32.totalorder %s891_s10, %s886_s7 }
  0x16   : > { %p895_p5 = scmp.lt.u32.totalorder %s886_s7, %s1085_s29 }
  0x17   : > { %p890_p1 = pneg %p889_p0  ;;  %p894_p4 = por %p893_p3, %p892_p2 }
  0x19   : > { %p896_p6 = por %p895_p5, %p894_p4 }
  0x1b   : > { %p897_p8 = pnand %p896_p6, %p890_p1 }
  0x1d   : > { %900 = shalt.err (!%p897_p8)
}
  0x1e   : > { %s901_s18 = scalar_lea.vmem %s1088_s4, 16  ;;  %s1002_s20 = smov [#allocation2]  }
  0x1f   : > { %p902_p12 = scmp.ne.s32.totalorder %s1088_s4, %s901_s18  ;;  %s906_s21 = sshll.u32 %s1002_s20, 4  ;;  %s907_s21 = int_to_ptr.vmem [resolvable:$false] %s906_s21 }
  0x20   : > { %s908_s22 = scalar_lea.vmem %s907_s21, 32  ;;  %p909_p11 = scmp.lt.s32.totalorder %s1088_s4, %s907_s21 }
  0x21   : > { %p904_p0 = pnand %p902_p12, %p888_p13  ;;  %p910_p2 = scmp.lt.s32.totalorder %s908_s22, %s901_s18 }
  0x23   : > { %p905_p10 = pneg %p904_p0  ;;  %p911_p3 = por %p910_p2, %p909_p11 }
  0x25   : > { %p912_p4 = pnand %p911_p3, %p905_p10 }
  0x27   : > { %915 = shalt.err (!%p912_p4)
}
  0x28   : > { %830 = dma.hbm_to_vmem [thread:$0]  (!%p1092_p9), %s1085_s29, 16, %s1088_s4, %s156_s6  }
  0x29   : > { %p1377_p1 = scmp.lt.s32.totalorder %s1000_s17, 3  ;;  %p1378_p5 = scmp.ge.s32.totalorder %s1000_s17, 1 }
  0x2a   : > { %s726_s27 = sshll.u32 %s1079_s25, 4  ;;  %s769_s28 = sshll.u32 %s996_s16, 8 }
  0x2b   : > { %p1128_p6 = pnand %p1378_p5, %p1377_p1  ;;  %s1137_s8 = scalar_lea.hbm %s1371_s2, %s769_s28 }
  0x2c   : > { %s182_s9 = scalar_lea.vmem [#allocation4], %s726_s27  ;;  %s179_s29 = scalar_lea.sflag [#allocation5], %s1079_s25 }
  0x2d   : > { %s189_s10 = sshll.u32 %s182_s9, 4  ;;  %s916_s4 = scalar_lea.hbm %s1137_s8, 256  ;;  %s1139_s10 = int_to_ptr.vmem [resolvable:$true] %s189_s10 }
  0x2e   : > { %p917_p10 = scmp.ne.s32.totalorder %s1137_s8, %s916_s4  ;;  %s921_s12 = scalar_lea.hbm %s1371_s2, 512 }
  0x2f   : > { %p922_p12 = scmp.lt.u32.totalorder %s1137_s8, %s1371_s2  ;;  %p923_p0 = scmp.lt.u32.totalorder %s921_s12, %s916_s4 }
  0x30   : > { %p919_p11 = pnand %p917_p10, %p888_p13  ;;  %p925_p3 = scmp.lt.u32.totalorder %s916_s4, %s1137_s8 }
  0x31   : > { %p924_p2 = por %p923_p0, %p922_p12 }
  0x32   : > { %p920_p8 = pneg %p919_p11 }
  0x33   : > { %p926_p4 = por %p925_p3, %p924_p2 }
  0x35   : > { %p927_p1 = pnand %p926_p4, %p920_p8 }
  0x37   : > { %930 = shalt.err (!%p927_p1)
}
  0x38   : > { %s931_s21 = scalar_lea.vmem %s1139_s10, 256  ;;  %s1003_s22 = smov [#allocation4]  }
  0x39   : > { %p932_p5 = scmp.ne.s32.totalorder %s1139_s10, %s931_s21  ;;  %s936_s27 = sshll.u32 %s1003_s22, 4  ;;  %s937_s27 = int_to_ptr.vmem [resolvable:$false] %s936_s27 }
  0x3a   : > { %s938_s28 = scalar_lea.vmem %s937_s27, 512  ;;  %p939_p7 = scmp.lt.s32.totalorder %s1139_s10, %s937_s27 }
  0x3b   : > { %p934_p10 = pnand %p932_p5, %p888_p13  ;;  %p940_p12 = scmp.lt.s32.totalorder %s938_s28, %s931_s21 }
  0x3d   : > { %p935_p11 = pneg %p934_p10  ;;  %p941_p0 = por %p940_p12, %p939_p7 }
  0x3f   : > { %p942_p2 = pnand %p941_p0, %p935_p11 }
  0x41   : > { %945 = shalt.err (!%p942_p2)
}
  0x42   : > { %s1004_s30 = smov 128   ;;  %s1005_s7 = smov 8  }
  0x43   : > { %833 = dma.hbm_to_vmem [thread:$0]  (!%p1092_p9), %s1137_s8, 256, %s1139_s10, %s179_s29, %s1004_s30, %s1004_s30, %s1005_s7  }
  0x44   : > { %201 = sbr.rel (%p1128_p6) target bundleno = 316 (0x13c), region = 32  ;;  %s203_s9 = sand.u32 (!%p1128_p6), 1, %s984_s13  }
  0x45   : > { %s204_s4 = scalar_lea.sflag (!%p1128_p6), [#allocation3], %s203_s9  ;;  %s206_s6 = scalar_lea.vmem (!%p1128_p6), [#allocation2], %s203_s9 }
  0x46   : > { %p1380_p7 = scmp.ne.s32.totalorder (!%p1128_p6), %s1375_s23, 0 }
  0x4b   : > { %971 = dma.done.wait (%p1380_p7), %s204_s4, 16  }
  0x4c   : > { %973 = vsyncadd (%p1380_p7), %s204_s4, 4294967280  ;;  %s730_s11 = sshll.u32 %s203_s9, 4  ;;  %s212_s12 = scalar_lea.sflag [#allocation5], %s203_s9 }
  0x4d   : > { %s215_s18 = scalar_lea.vmem [#allocation4], %s730_s11 }
  0x4e   : > { %975 = dma.done.wait (%p1380_p7), %s212_s12, 256  }
  0x4f   : > { %977 = vsyncadd (%p1380_p7), %s212_s12, 4294967040  ;;  %p249_p9 = scmp.lt.s32.totalorder %s992_s15, 1  ;;  %v263_v0 = vlaneseq  ;;  %vm389_vm0 = vcmask 130048   ;;  %v387_v5 = vld [vmem:[%s215_s18] sm:$0xff]  ;;  %v388_v6 = vld [vmem:[%s215_s18 + $0x8] sm:$0xff]  ;;  %v1006_v14 = vmov 0.0  }
  0x50   : > { %v1191_v7 = vld [vmem:[%s206_s6] ss:$0 sm:$0xff]  ;;  %v817_v10 = vpack.c.bf16 %v388_v6, %v387_v5 }
  0x51   : > { %s1389_s15 = smov (!%p249_p9, %s992_s15), 1  ;;  %v1182_v1 = vshrl.u32 %v263_v0, 7 }
  0x52   : > { %s251_s26 = scalar_lea.vmem %s1370_s1, %s1389_s15  ;;  %818 = vmatprep.subr.bf16.mxu0 %v817_v10  ;;  %821 = vmatprep.subr.bf16.mxu1 %v817_v10  ;;  %s770_s23 = sshll.u32 %s1389_s15, 7 }
  0x53   : > { %v272_v2 = vadd.s32 64, %v1182_v1  ;;  %v265_v3 = vadd.s32 8, %v1182_v1  ;;  %v273_v4 = vadd.s32 72, %v1182_v1  ;;  %v266_v8 = vadd.s32 16, %v1182_v1  ;;  %v1195_v11 = vld [vmem:[%s251_s26] ss:$0 sm:$0xff]  ;;  %820 = vmatpush3.bf16.msra.mxu0 %v817_v10  ;;  %822 = vmatpush3.bf16.msra.mxu1 %v817_v10  ;;  %s1317_s29 = scalar_lea.vmem %s1372_s3, %s770_s23 }
  0x54   : > { %v274_v9 = vadd.s32 80, %v1182_v1  ;;  %vm303_vm1 = vcmp.ge.s32.totalorder %v1182_v1, %v1191_v7  ;;  %v267_v12 = vadd.s32 24, %v1182_v1  ;;  %vm323_vm3 = vcmp.lt.s32.totalorder %v1182_v1, %v1195_v11 }
  0x55   : > { %vm311_vm2 = vcmp.ge.s32.totalorder %v272_v2, %v1191_v7  ;;  %vm331_vm4 = vcmp.lt.s32.totalorder %v272_v2, %v1195_v11  ;;  %vm304_vm5 = vcmp.ge.s32.totalorder %v265_v3, %v1191_v7  ;;  %vm324_vm6 = vcmp.lt.s32.totalorder %v265_v3, %v1195_v11  ;;  %vm339_vm7 = vmand %vm303_vm1, %vm323_vm3 }
  0x56   : > { %vm312_vm8 = vcmp.ge.s32.totalorder %v273_v4, %v1191_v7  ;;  %vm332_vm9 = vcmp.lt.s32.totalorder %v273_v4, %v1195_v11  ;;  %v275_v13 = vadd.s32 88, %v1182_v1  ;;  %v735_v15 = vsel %vm339_vm7, 1.0, %v1006_v14  ;;  %vm347_vm10 = vmand %vm311_vm2, %vm331_vm4 }
  0x57   : > { %vm305_vm11 = vcmp.ge.s32.totalorder %v266_v8, %v1191_v7  ;;  %vm325_vm12 = vcmp.lt.s32.totalorder %v266_v8, %v1195_v11  ;;  %v268_v16 = vadd.s32 32, %v1182_v1  ;;  %793 = vmatprep.mubr.msk.f32.mxu0 %vm389_vm0, %v735_v15  ;;  %v743_v17 = vsel %vm347_vm10, 1.0, %v1006_v14  ;;  %vm340_vm13 = vmand %vm304_vm5, %vm324_vm6 }
  0x58   : > { %vm313_vm14 = vcmp.ge.s32.totalorder %v274_v9, %v1191_v7  ;;  %vm333_vm15 = vcmp.lt.s32.totalorder %v274_v9, %v1195_v11  ;;  %v276_v18 = vadd.s32 96, %v1182_v1  ;;  %805 = vmatprep.mubr.msk.f32.mxu1 %vm389_vm0, %v743_v17  ;;  %v736_v19 = vsel %vm340_vm13, 1.0, %v1006_v14  ;;  %vm348_vm1 = vmand %vm312_vm8, %vm332_vm9 }
  0x59   : > { %vm306_vm2 = vcmp.ge.s32.totalorder %v267_v12, %v1191_v7  ;;  %vm326_vm3 = vcmp.lt.s32.totalorder %v267_v12, %v1195_v11  ;;  %v269_v20 = vadd.s32 40, %v1182_v1  ;;  %794 = vmatmul.mubr.msk.f32.vlgmr.msra.gmra.mrb[0].mxu0 %vm389_vm0, %v736_v19  ;;  %v744_v21 = vsel %vm348_vm1, 1.0, %v1006_v14  ;;  %vm341_vm4 = vmand %vm305_vm11, %vm325_vm12 }
  0x5a   : > { %vm314_vm5 = vcmp.ge.s32.totalorder %v275_v13, %v1191_v7  ;;  %vm334_vm6 = vcmp.lt.s32.totalorder %v275_v13, %v1195_v11  ;;  %v277_v22 = vadd.s32 104, %v1182_v1  ;;  %806 = vmatmul.mubr.msk.f32.vlgmr.msra.gmra.mrb[0].mxu1 %vm389_vm0, %v744_v21  ;;  %v737_v23 = vsel %vm341_vm4, 1.0, %v1006_v14  ;;  %vm349_vm7 = vmand %vm313_vm14, %vm333_vm15 }
  0x5b   : > { %vm307_vm8 = vcmp.ge.s32.totalorder %v268_v16, %v1191_v7  ;;  %vm327_vm9 = vcmp.lt.s32.totalorder %v268_v16, %v1195_v11  ;;  %v270_v24 = vadd.s32 48, %v1182_v1  ;;  %796 = vmatprep.mubr.msk.f32.mxu0 %vm389_vm0, %v737_v23  ;;  %v745_v25 = vsel %vm349_vm7, 1.0, %v1006_v14  ;;  %vm342_vm10 = vmand %vm306_vm2, %vm326_vm3 }
  0x5c   : > { %vm315_vm11 = vcmp.ge.s32.totalorder %v276_v18, %v1191_v7  ;;  %vm335_vm12 = vcmp.lt.s32.totalorder %v276_v18, %v1195_v11  ;;  %v278_v26 = vadd.s32 112, %v1182_v1  ;;  %808 = vmatprep.mubr.msk.f32.mxu1 %vm389_vm0, %v745_v25  ;;  %v738_v27 = vsel %vm342_vm10, 1.0, %v1006_v14  ;;  %vm350_vm13 = vmand %vm314_vm5, %vm334_vm6 }
  0x5d   : > { %vm308_vm14 = vcmp.ge.s32.totalorder %v269_v20, %v1191_v7  ;;  %vm328_vm15 = vcmp.lt.s32.totalorder %v269_v20, %v1195_v11  ;;  %v271_v28 = vadd.s32 56, %v1182_v1  ;;  %797 = vmatmul.mubr.msk.f32.gmra.mrb[2].mxu0 %vm389_vm0, %v738_v27  ;;  %v746_v29 = vsel %vm350_vm13, 1.0, %v1006_v14  ;;  %vm343_vm1 = vmand %vm307_vm8, %vm327_vm9 }
  0x5e   : > { %vm316_vm2 = vcmp.ge.s32.totalorder %v277_v22, %v1191_v7  ;;  %vm336_vm3 = vcmp.lt.s32.totalorder %v277_v22, %v1195_v11  ;;  %v279_v30 = vadd.s32 120, %v1182_v1  ;;  %809 = vmatmul.mubr.msk.f32.gmra.mrb[2].mxu1 %vm389_vm0, %v746_v29  ;;  %v739_v31 = vsel %vm343_vm1, 1.0, %v1006_v14  ;;  %vm351_vm4 = vmand %vm315_vm11, %vm335_vm12 }
  0x5f   : > { %vm309_vm5 = vcmp.ge.s32.totalorder %v270_v24, %v1191_v7  ;;  %vm329_vm6 = vcmp.lt.s32.totalorder %v270_v24, %v1195_v11  ;;  %799 = vmatprep.mubr.msk.f32.mxu0 %vm389_vm0, %v739_v31  ;;  %v747_v32 = vsel %vm351_vm4, 1.0, %v1006_v14  ;;  %vm344_vm7 = vmand %vm308_vm14, %vm328_vm15  ;;  %vm317_vm8 = vcmp.ge.s32.totalorder %v278_v26, %v1191_v7 }
  0x60   : > { %vm337_vm9 = vcmp.lt.s32.totalorder %v278_v26, %v1195_v11  ;;  %811 = vmatprep.mubr.msk.f32.mxu1 %vm389_vm0, %v747_v32  ;;  %v740_v33 = vsel %vm344_vm7, 1.0, %v1006_v14  ;;  %vm352_vm10 = vmand %vm316_vm2, %vm336_vm3  ;;  %vm310_vm11 = vcmp.ge.s32.totalorder %v271_v28, %v1191_v7  ;;  %vm330_vm12 = vcmp.lt.s32.totalorder %v271_v28, %v1195_v11 }
  0x61   : > { %800 = vmatmul.mubr.msk.f32.gmra.mrb[4].mxu0 %vm389_vm0, %v740_v33  ;;  %v748_v34 = vsel %vm352_vm10, 1.0, %v1006_v14  ;;  %vm345_vm13 = vmand %vm309_vm5, %vm329_vm6  ;;  %vm318_vm14 = vcmp.ge.s32.totalorder %v279_v30, %v1191_v7  ;;  %vm338_vm15 = vcmp.lt.s32.totalorder %v279_v30, %v1195_v11  ;;  %vm583_vm4 = vcmask 523264  }
  0x62   : > { %812 = vmatmul.mubr.msk.f32.gmra.mrb[4].mxu1 %vm389_vm0, %v748_v34  ;;  %v741_v35 = vsel %vm345_vm13, 1.0, %v1006_v14  ;;  %vm353_vm1 = vmand %vm317_vm8, %vm337_vm9 }
  0x63   : > { %802 = vmatprep.mubr.msk.f32.mxu0 %vm389_vm0, %v741_v35  ;;  %v749_v36 = vsel %vm353_vm1, 1.0, %v1006_v14  ;;  %vm346_vm2 = vmand %vm310_vm11, %vm330_vm12 }
  0x64   : > { %814 = vmatprep.mubr.msk.f32.mxu1 %vm389_vm0, %v749_v36  ;;  %v742_v37 = vsel %vm346_vm2, 1.0, %v1006_v14  ;;  %vm354_vm3 = vmand %vm318_vm14, %vm338_vm15 }
  0x65   : > { %803 = vmatmul.mubr.msk.f32.gmra.mrb[6].mxu0 %vm389_vm0, %v742_v37  ;;  %v750_v38 = vsel %vm354_vm3, 1.0, %v1006_v14 }
  0x66   : > { %815 = vmatmul.mubr.msk.f32.gmra.mrb[6].mxu1 %vm389_vm0, %v750_v38 }
 0x12c   : > { %v795_v39 = vpop.f32.mrb[0].mxu0 }
 0x12d   : > { %585 = vst.msk [vmem:[%s1317_s29 + $0x8] sm:$0xff] %vm583_vm4, %v795_v39  ;;  %v807_v40 = vpop.f32.mrb[0].mxu1  ;;  %v504_v41 = vpop.f32.mrb[1].mxu0 }
 0x12e   : > { %593 = vst.msk [vmem:[%s1317_s29 + $0x48] sm:$0xff] %vm583_vm4, %v807_v40  ;;  %584 = vst.msk [vmem:[%s1317_s29] sm:$0xff] %vm583_vm4, %v504_v41  ;;  %v544_v42 = vpop.f32.mrb[1].mxu1 }
 0x12f   : > { %592 = vst.msk [vmem:[%s1317_s29 + $0x40] sm:$0xff] %vm583_vm4, %v544_v42 }
 0x130   : > { %v798_v43 = vpop.f32.mrb[2].mxu0 }
 0x131   : > { %587 = vst.msk [vmem:[%s1317_s29 + $0x18] sm:$0xff] %vm583_vm4, %v798_v43  ;;  %v810_v44 = vpop.f32.mrb[2].mxu1  ;;  %v514_v45 = vpop.f32.mrb[3].mxu0 }
 0x132   : > { %595 = vst.msk [vmem:[%s1317_s29 + $0x58] sm:$0xff] %vm583_vm4, %v810_v44  ;;  %586 = vst.msk [vmem:[%s1317_s29 + $0x10] sm:$0xff] %vm583_vm4, %v514_v45  ;;  %v554_v46 = vpop.f32.mrb[3].mxu1 }
 0x133   : > { %594 = vst.msk [vmem:[%s1317_s29 + $0x50] sm:$0xff] %vm583_vm4, %v554_v46 }
 0x134   : > { %v801_v47 = vpop.f32.mrb[4].mxu0 }
 0x135   : > { %589 = vst.msk [vmem:[%s1317_s29 + $0x28] sm:$0xff] %vm583_vm4, %v801_v47  ;;  %v813_v48 = vpop.f32.mrb[4].mxu1  ;;  %v524_v49 = vpop.f32.mrb[5].mxu0 }
 0x136   : > { %597 = vst.msk [vmem:[%s1317_s29 + $0x68] sm:$0xff] %vm583_vm4, %v813_v48  ;;  %588 = vst.msk [vmem:[%s1317_s29 + $0x20] sm:$0xff] %vm583_vm4, %v524_v49  ;;  %v564_v50 = vpop.f32.mrb[5].mxu1 }
 0x137   : > { %596 = vst.msk [vmem:[%s1317_s29 + $0x60] sm:$0xff] %vm583_vm4, %v564_v50 }
 0x138   : > { %v804_v51 = vpop.f32.mrb[6].mxu0 }
 0x139   : > { %591 = vst.msk [vmem:[%s1317_s29 + $0x38] sm:$0xff] %vm583_vm4, %v804_v51  ;;  %v816_v52 = vpop.f32.mrb[6].mxu1  ;;  %v534_v53 = vpop.f32.mrb[7].mxu0 }
 0x13a   : > { %599 = vst.msk [vmem:[%s1317_s29 + $0x78] sm:$0xff] %vm583_vm4, %v816_v52  ;;  %590 = vst.msk [vmem:[%s1317_s29 + $0x30] sm:$0xff] %vm583_vm4, %v534_v53  ;;  %v574_v54 = vpop.f32.mrb[7].mxu1 }
 0x13b   : > { %598 = vst.msk [vmem:[%s1317_s29 + $0x70] sm:$0xff] %vm583_vm4, %v574_v54 }
 0x13c PF: > { %s19_s17 = sadd.s32 1, %s1000_s17   ;;  %s1381_s12 = smov %s984_s13 }
 0x13d   : > { %p16_p13 = scmp.ge.s32.totalorder %s19_s17, 4   ;;  %s1382_s13 = smov %s988_s14 }
 0x13e   : > { %s1383_s14 = smov %s1076_s24  ;;  %s1384_s15 = smov %s996_s16 }
 0x13f   : > { %s1385_s16 = smov %s1387_s19  ;;  %18 = sbr.rel (!%p16_p13) target bundleno = 6 (0x6), region = 88 }
 0x146   :  { %630 = vsyncpa [#allocation3], 1 }
 0x147   :  { %632 = vsyncpa [#allocation3 + $0x1], 1 }
 0x148   :  { %633 = vsyncpa [#allocation5], 1 }
 0x149   :  { %635 = vsyncpa [#allocation5 + $0x1], 1 }

</bundles_post_ra>
